<compile_context>
chip_gen: v7x
topology: tpu7x:2x2x1
jax: 0.10.0
libtpu: 0.0.40
codegen_flags: <defaults>
</compile_context>

<pallas_src>
import functools

import jax
import jax.numpy as jnp
import numpy as np
from jax.experimental import pallas as pl
from jax.experimental.pallas import tpu as pltpu


def _shortcut_kernel(x_ref, sel_ref, o_ref, *, b, c, pad, precision):
    # x_ref:   (B, c, K)            B images, channels major, spatial flattened
    # sel_ref: (K, N)               one-hot even-row/even-col selector (VMEM-resident)
    # o_ref:   (B, c + 2*pad, N)
    k = x_ref.shape[-1]
    n_out = o_ref.shape[-1]

    # Fold the B images into the matmul M dimension: one MXU dot with B*c rows.
    x = x_ref[...].reshape(b * c, k)                       # (B*c, K)
    ds = jax.lax.dot(
        x,
        sel_ref[...],
        precision=precision,                               # HIGHEST only for f32 (exact gather)
        preferred_element_type=jnp.float32,
    ).astype(o_ref.dtype)                                  # (B*c, N)
    ds = ds.reshape(b, c, n_out)

    # Channel zero-padding lands on the second-minor axis: plain contiguous
    # sliced stores (no in-kernel concatenate), scales cleanly with B.
    if pad > 0:
        zeros = jnp.zeros((b, pad, n_out), dtype=o_ref.dtype)
        o_ref[:, pl.ds(0, pad), :] = zeros                 # leading zero channels
        o_ref[:, pl.ds(pad + c, pad), :] = zeros           # trailing zero channels
    o_ref[:, pl.ds(pad, c), :] = ds                        # downsampled feature map


def _even_selection_matrix(h_in, w_in, h2, w2, dtype):
    """One-hot S with S[hi*w_in + wi, ho*w2 + wo] = 1 iff hi == 2*ho and wi == 2*wo."""
    sel = np.zeros((h_in * w_in, h2 * w2), dtype=np.float32)
    rows = (2 * np.arange(h2)[:, None] * w_in + 2 * np.arange(w2)[None, :]).ravel()
    sel[rows, np.arange(h2 * w2)] = 1.0
    return jnp.asarray(sel, dtype=dtype)


def _choose_batch_tile(n, c, c_out, k, n_out, dsize):
    """Images per grid step.

    Targets: fill the MXU M dimension (B*c >= 256), keep >= 2 (ideally >= 4)
    grid steps so the 'parallel' axis can shard across v7x's two TensorCores,
    and stay inside a conservative VMEM budget: live VMEM ~= 2 (double buffer)
    * B * (in + out blocks) + 2 * |S|, capped at ~12 MiB (under v5e's 16 MiB
    scoped default; far under v6e/v7x limits)."""
    target_rows = 256
    b = max(1, -(-target_rows // c))                       # ceil(256 / c)
    if n >= 4:
        b = min(b, max(1, n // 4))
    elif n >= 2:
        b = min(b, max(1, n // 2))
    else:
        b = 1

    budget = 12 * 1024 * 1024
    sel_bytes = 2 * k * n_out * dsize                      # selector + its pipeline copy

    def live(bb):
        return 2 * bb * (c * k + c_out * n_out) * dsize + sel_bytes

    while b > 1 and live(b) > budget:
        b -= 1
    return b


def lambda_shortcut(x_nchw, planes):
    """Pallas implementation of
         lambda x: F.pad(x[:, :, ::2, ::2], (0,0,0,0, planes//4, planes//4), "constant", 0)
       Input and output are NCHW, exactly like the PyTorch module."""
    n, c, h, w = x_nchw.shape
    pad = planes // 4
    h2 = (h + 1) // 2            # x[:, :, ::2, ::2] keeps ceil(H/2) rows
    w2 = (w + 1) // 2            # and ceil(W/2) cols
    c_out = c + 2 * pad

    # Pad H/W up to even so the flat even-index selection is well defined; the
    # padded row/col is never selected.  Never taken for ResNet-20 call sites.
    h_e, w_e = 2 * h2, 2 * w2
    if (h_e, w_e) != (h, w):
        # TODO(synk): fold odd-H/W handling into the selector instead of a wrapper-side pad copy.
        x_nchw = jnp.pad(x_nchw, ((0, 0), (0, 0), (0, h_e - h), (0, w_e - w)))

    k = h_e * w_e
    n_out = h2 * w2
    dsize = jnp.dtype(x_nchw.dtype).itemsize

    b = _choose_batch_tile(n, c, c_out, k, n_out, dsize)
    n_pad = -(-n // b) * b                                 # round batch up to a multiple of B

    x_flat = x_nchw.reshape(n, c, k)                       # free reshape, stays NCHW
    if n_pad != n:
        x_flat = jnp.pad(x_flat, ((0, n_pad - n), (0, 0), (0, 0)))

    sel = _even_selection_matrix(h_e, w_e, h2, w2, x_flat.dtype)

    # HIGHEST keeps the one-hot gather exact for f32 activations; for bf16 the
    # gather is already exact (bf16 * 1.0) and a single-pass matmul suffices.
    precision = (jax.lax.Precision.HIGHEST if x_flat.dtype == jnp.float32
                 else jax.lax.Precision.DEFAULT)

    kernel = functools.partial(_shortcut_kernel, b=b, c=c, pad=pad, precision=precision)

    cost = pl.CostEstimate(
        flops=2 * n_pad * c * k * n_out,
        transcendentals=0,
        bytes_accessed=(n_pad * c * k + n_pad * c_out * n_out + k * n_out) * dsize,
    )

    out_flat = pl.pallas_call(
        kernel,
        out_shape=jax.ShapeDtypeStruct((n_pad, c_out, n_out), x_flat.dtype),
        grid=(n_pad // b,),
        in_specs=[
            pl.BlockSpec((b, c, k), lambda i: (i, 0, 0)),          # B whole images per step
            pl.BlockSpec((k, n_out), lambda i: (0, 0)),            # grid-invariant selector
        ],
        out_specs=pl.BlockSpec((b, c_out, n_out), lambda i: (i, 0, 0)),
        compiler_params=pltpu.CompilerParams(dimension_semantics=("parallel",)),
        cost_estimate=cost,
    )(x_flat, sel)

    out_flat = out_flat[:n]                                # drop batch padding, if any
    return out_flat.reshape(n, c_out, h2, w2)              # free reshape back to NCHW


class LambdaLayer:
    """Faithful mirror of the PyTorch module: holds an arbitrary callable and applies it."""

    def __init__(self, lambd):
        self.lambd = lambd

    def __call__(self, x):
        return self.lambd(x)


if __name__ == "__main__":
    # Small shapes consistent with the ResNet-20 usage: in_planes=4 -> planes=8 (pad=2 per side).
    key = jax.random.PRNGKey(0)
    x = jax.random.normal(key, (2, 4, 16, 16), dtype=jnp.float32)  # NCHW
    planes = 8

    layer = LambdaLayer(lambda t: lambda_shortcut(t, planes=planes))
    out = jax.block_until_ready(layer(x))

    # Reference (plain JAX) check of the exact PyTorch semantics.
    pad = planes // 4
    expected = jnp.pad(x[:, :, ::2, ::2], ((0, 0), (pad, pad), (0, 0), (0, 0)))
    assert out.shape == expected.shape and out.dtype == expected.dtype
    np.testing.assert_allclose(np.asarray(out), np.asarray(expected), rtol=0.0, atol=1e-6)

    print("KERNEL_OK")
</pallas_src>

<mosaic_0001>
module attributes {stable_mosaic.version = 11 : i64} {
  func.func @_shortcut_kernel(%arg0: i32, %arg1: memref<1x4x256xf32, #tpu.memory_space<vmem>>, %arg2: memref<256x64xf32, #tpu.memory_space<vmem>>, %arg3: memref<1x8x64xf32, #tpu.memory_space<vmem>>) attributes {dimension_semantics = [#tpu.dimension_semantics<parallel>], iteration_bounds = array<i64: 2>, scalar_prefetch = 0 : i64, scratch_operands = 0 : i64, tpu.core_type = #tpu.core_type<tc>, window_params = [{transform_indices = @transform_0, window_bounds = array<i64: 1, 4, 256>}, {pipeline_mode = #tpu.pipeline_mode<synchronous>, transform_indices = @transform_1, window_bounds = array<i64: 256, 64>}, {transform_indices = @transform_2, window_bounds = array<i64: 1, 8, 64>}]} {
    %c0 = arith.constant 0 : index
    %c0_0 = arith.constant 0 : index
    %c0_1 = arith.constant 0 : index
    %0 = vector.load %arg1[%c0, %c0_0, %c0_1] : memref<1x4x256xf32, #tpu.memory_space<vmem>>, vector<1x4x256xf32>
    %1 = vector.shape_cast %0 : vector<1x4x256xf32> to vector<4x256xf32>
    %c0_2 = arith.constant 0 : index
    %c0_3 = arith.constant 0 : index
    %2 = vector.load %arg2[%c0_2, %c0_3] : memref<256x64xf32, #tpu.memory_space<vmem>>, vector<256x64xf32>
    %cst = arith.constant dense<0.000000e+00> : vector<4x64xf32>
    %3 = tpu.matmul %1, %2, %cst {dimension_numbers = #tpu.dot_dimension_numbers<[1], [0], [0], [1], [0, 0, 1, 1], [], []>, precision = #tpu.contract_precision<fp32>} : vector<4x256xf32>, vector<256x64xf32>, vector<4x64xf32> -> vector<4x64xf32>
    %4 = vector.shape_cast %3 : vector<4x64xf32> to vector<1x4x64xf32>
    %cst_4 = arith.constant 0.000000e+00 : f32
    %5 = vector.broadcast %cst_4 : f32 to vector<1x2x64xf32>
    %c0_5 = arith.constant 0 : index
    %c0_6 = arith.constant 0 : index
    %c0_7 = arith.constant 0 : index
    %6 = vector.load %arg3[%c0_5, %c0_6, %c0_7] : memref<1x8x64xf32, #tpu.memory_space<vmem>>, vector<1x2x64xf32>
    tpu.vector_store %arg3[%c0_5, %c0_6, %c0_7], %5 {strides = array<i32>} : memref<1x8x64xf32, #tpu.memory_space<vmem>>, vector<1x2x64xf32>,
    %c0_8 = arith.constant 0 : index
    %c6 = arith.constant 6 : index
    %c0_9 = arith.constant 0 : index
    %7 = vector.load %arg3[%c0_8, %c6, %c0_9] : memref<1x8x64xf32, #tpu.memory_space<vmem>>, vector<1x2x64xf32>
    tpu.vector_store %arg3[%c0_8, %c6, %c0_9], %5 {strides = array<i32>} : memref<1x8x64xf32, #tpu.memory_space<vmem>>, vector<1x2x64xf32>,
    %c0_10 = arith.constant 0 : index
    %c2 = arith.constant 2 : index
    %c0_11 = arith.constant 0 : index
    %8 = vector.load %arg3[%c0_10, %c2, %c0_11] : memref<1x8x64xf32, #tpu.memory_space<vmem>>, vector<1x4x64xf32>
    tpu.vector_store %arg3[%c0_10, %c2, %c0_11], %4 {strides = array<i32>} : memref<1x8x64xf32, #tpu.memory_space<vmem>>, vector<1x4x64xf32>,
    return
  }
  func.func @transform_0(%arg0: i32) -> (i32, i32, i32) {
    %c0_i32 = arith.constant 0 : i32
    %c0_i32_0 = arith.constant 0 : i32
    %c0_i32_1 = arith.constant 0 : i32
    return %arg0, %c0_i32, %c0_i32_0 : i32, i32, i32
  }
  func.func @transform_1(%arg0: i32) -> (i32, i32) {
    %c0_i32 = arith.constant 0 : i32
    %c0_i32_0 = arith.constant 0 : i32
    %c0_i32_1 = arith.constant 0 : i32
    return %c0_i32, %c0_i32_0 : i32, i32
  }
  func.func @transform_2(%arg0: i32) -> (i32, i32, i32) {
    %c0_i32 = arith.constant 0 : i32
    %c0_i32_0 = arith.constant 0 : i32
    %c0_i32_1 = arith.constant 0 : i32
    return %arg0, %c0_i32, %c0_i32_0 : i32, i32, i32
  }
}

</mosaic_0001>

<bundles_post_ra>
// kernel: tpu_custom_call.1
= control target key start
LH: loop header
LB: loop body
LE: loop exit
PB: predicated region body
PF: predicated region fallthrough
CT: control target
= control target key end

     0   :  { %7 = vsyncpa [#allocation3], 0  ;;  %s2265_s0 = inlined_call_operand.vmem [shape: f32[2,4,256], index: 0, kind: input, shape index: {}]   ;;  %s2266_s1 = inlined_call_operand.vmem [shape: f32[256,64], index: 1, kind: input, shape index: {}]   ;;  %s2267_s2 = inlined_call_operand.hbm [shape: f32[2,8,64], index: 2, kind: output, shape index: {}]  }
   0x1   :  { %9 = vsyncpa [#allocation3 + $0x1], 0  ;;  %s1654_s9 = smov 0   ;;  %s1656_s10 = smov 0  }
   0x2   :  { %s1658_s11 = smov 0   ;;  %s1660_s12 = smov 0  }
   0x3 LB: > { %s1675_s13 = sadd.s32 4294967295, %s1635_s12   ;;  %s1118_s14 = sadd.s32 4294967294, %s1635_s12   ;;  %s1635_s12 = sphi %s1660_s12, %s2359_s12   ;;  %s1631_s11 = sphi %s1658_s11, %s2358_s11   ;;  %s1627_s10 = sphi %s1656_s10, %s2357_s10   ;;  %s1623_s9 = sphi %s1654_s9, %s2356_s9  }
   0x4   : > { %s1679_s15 = sadd.s32 1, %s1635_s12   ;;  %s69_s16 = sadd.s32 1, %s1631_s11 }
   0x5   : > { %s66_s17 = ssub.s32 %s1635_s12, %s1679_s15  ;;  %p79_p0 = scmp.ne.s32.totalorder %s1631_s11, %s1627_s10 }
   0x6   : > { %p67_p1 = scmp.eq.s32.totalorder %s66_s17, 0  ;;  %p80_p2 = scmp.eq.s32.totalorder %s1675_s13, 1 }
   0x7   : > { %p85_p3 = scmp.ne.s32.totalorder %s1627_s10, %s1623_s9  ;;  %p86_p4 = scmp.eq.s32.totalorder %s1118_s14, 1 }
   0x8   : > { %s1690_s18 = scalar_select %p67_p1, %s1631_s11, %s69_s16  }
   0x9   : > { %p1692_p5 = por %p80_p2, %p79_p0  ;;  %p1696_p6 = por %p86_p4, %p85_p3 }
   0xa   : > { %p1121_p7 = scmp.ge.s32.totalorder %s1635_s12, 1  ;;  %p115_p8 = scmp.lt.s32.totalorder %s1635_s12, 3 }
   0xc   : > { %p116_p9 = pnand %p1121_p7, %p115_p8 }
   0xe   : > { %119 = sbr.rel (%p116_p9) target bundleno = 376 (0x178), region = 28 }
  0x15   : > { %v159_v0 = vld [vmem:[%s2266_s1 + $0x80] sm:$0xff]  ;;  %v160_v1 = vld [vmem:[%s2266_s1 + $0x88] sm:$0xff]  ;;  %v161_v7 = vld [vmem:[%s2266_s1 + $0x90] sm:$0xff]  ;;  %p137_p10 = scmp.lt.s32.totalorder %s1675_s13, 1  ;;  %s134_s5 = sand.u32 1, %s1627_s10   ;;  %vm1040_vm0 = vcmask 517120  }
  0x16   : > { %v143_v2 = vld [vmem:[%s2266_s1] sm:$0xff]  ;;  %v227_v3 = vand.u32 4294901760, %v159_v0  ;;  %v230_v4 = vand.u32 4294901760, %v160_v1  ;;  %v144_v5 = vld [vmem:[%s2266_s1 + $0x8] sm:$0xff]  ;;  %v162_v8 = vld [vmem:[%s2266_s1 + $0x98] sm:$0xff]  ;;  %v233_v10 = vand.u32 4294901760, %v161_v7 }
  0x17   : > { %v179_v6 = vand.u32 4294901760, %v143_v2  ;;  %v182_v9 = vand.u32 4294901760, %v144_v5  ;;  %v236_v11 = vand.u32 4294901760, %v162_v8  ;;  %v145_v12 = vld [vmem:[%s2266_s1 + $0x10] sm:$0xff]  ;;  %v146_v13 = vld [vmem:[%s2266_s1 + $0x18] sm:$0xff]  ;;  %v163_v18 = vld [vmem:[%s2266_s1 + $0xa0] sm:$0xff] }
  0x18   : > { %v1726_v14 = vpack.c.bf16 %v230_v4, %v227_v3  ;;  %v185_v16 = vand.u32 4294901760, %v145_v12  ;;  %v188_v17 = vand.u32 4294901760, %v146_v13  ;;  %v164_v19 = vld [vmem:[%s2266_s1 + $0xa8] sm:$0xff]  ;;  %v147_v23 = vld [vmem:[%s2266_s1 + $0x20] sm:$0xff]  ;;  %v1749_v25 = vsub.f32 %v161_v7, %v233_v10  ;;  %v165_v37 = vld [vmem:[%s2266_s1 + $0xb0] sm:$0xff]  ;;  %s1926_s14 = scalar_select %p137_p10, %s1675_s13, 1 }
  0x19   : > { %v1728_v15 = vsub.f32 %v143_v2, %v179_v6  ;;  %v1736_v20 = vpack.c.bf16 %v182_v9, %v179_v6  ;;  %v1738_v21 = vsub.f32 %v144_v5, %v182_v9  ;;  %v1740_v22 = vpack.c.bf16 %v236_v11, %v233_v10  ;;  %v148_v24 = vld [vmem:[%s2266_s1 + $0x28] sm:$0xff]  ;;  %v166_v42 = vld [vmem:[%s2266_s1 + $0xb8] sm:$0xff]  ;;  %v149_v55 = vld [vmem:[%s2266_s1 + $0x30] sm:$0xff]  ;;  %s1122_s6 = sshll.u32 %s134_s5, 3  ;;  %s1126_s8 = sshll.u32 %s1675_s13, 7 }
  0x1a   : > { %1341 = vmatprep.subr.bf16.mxu0 %v1726_v14  ;;  %v1751_v26 = vsub.f32 %v162_v8, %v236_v11  ;;  %v1753_v27 = vpack.c.bf16 %v188_v17, %v185_v16  ;;  %v1755_v28 = vsub.f32 %v145_v12, %v185_v16  ;;  %v239_v29 = vand.u32 4294901760, %v163_v18  ;;  %v150_v56 = vld [vmem:[%s2266_s1 + $0x38] sm:$0xff]  ;;  %v167_v5 = vld [vmem:[%s2266_s1 + $0xc0] sm:$0xff]  ;;  %v168_v6 = vld [vmem:[%s2266_s1 + $0xc8] sm:$0xff]  ;;  %s1129_s25 = sshll.u32 %s1926_s14, 3  ;;  %s2211_s7 = scalar_lea.vmem [#allocation2], %s1122_s6 }
  0x1b   : > { %1343 = vmatpush3.bf16.msra.mxu0 %v1736_v20  ;;  %v242_v30 = vand.u32 4294901760, %v164_v19  ;;  %v1758_v31 = vsub.f32 %v159_v0, %v227_v3  ;;  %v1760_v32 = vsub.f32 %v160_v1, %v230_v4  ;;  %v191_v33 = vand.u32 4294901760, %v147_v23  ;;  %v151_v11 = vld [vmem:[%s2266_s1 + $0x40] sm:$0xff]  ;;  %s141_s4 = scalar_lea.vmem %s2265_s0, %s1129_s25  ;;  %s1059_s14 = sshll.u32 %s2211_s7, 4  ;;  %s2222_s14 = int_to_ptr.vmem [resolvable:$true] %s1059_s14 }
  0x1c   : > { %1345 = vmatprep.subr.bf16.mxu0 %v1740_v22  ;;  %v194_v34 = vand.u32 4294901760, %v148_v24  ;;  %v2285_v35 = vand.u32 4294901760, %v1728_v15  ;;  %v2284_v36 = vand.u32 4294901760, %v1738_v21  ;;  %v1768_v38 = vsub.f32 %v146_v13, %v188_v17  ;;  %s2220_s21 = scalar_lea.hbm %s2267_s2, %s1126_s8  ;;  %s1046_s22 = scalar_lea.sflag [#allocation3], %s134_s5 }
  0x1d   : > { %v1770_v39 = vpack.c.bf16 %v242_v30, %v239_v29  ;;  %v1772_v40 = vsub.f32 %v163_v18, %v239_v29  ;;  %v2287_v41 = vand.u32 4294901760, %v1758_v31  ;;  %v1778_v43 = vsub.f32 %v164_v19, %v242_v30  ;;  %v152_v29 = vld [vmem:[%s2266_s1 + $0x48] sm:$0xff]  ;;  %s1573_s23 = scalar_lea.vmem %s2222_s14, 128  ;;  %s1638_s13 = smov [#allocation2]  }
  0x1e   : > { %v2286_v44 = vand.u32 4294901760, %v1760_v32  ;;  %v1781_v45 = vpack.c.bf16 %v194_v34, %v191_v33  ;;  %v1783_v46 = vsub.f32 %v147_v23, %v191_v33  ;;  %v294_v48 = vsub.f32 %v1728_v15, %v2285_v35  ;;  %p1574_p11 = scmp.ne.s32.totalorder %s2222_s14, %s1573_s23  ;;  %s1577_s24 = sshll.u32 %s1638_s13, 4  ;;  %s1578_s24 = int_to_ptr.vmem [resolvable:$false] %s1577_s24 }
  0x1f   : > { %1347 = vmatpush3.bf16.msra.mxu0 %v1753_v27  ;;  %v406_v47 = vsub.f32 %v1758_v31, %v2287_v41  ;;  %v301_v49 = vsub.f32 %v1738_v21, %v2284_v36  ;;  %v245_v50 = vand.u32 4294901760, %v165_v37  ;;  %v248_v52 = vand.u32 4294901760, %v166_v42  ;;  %v142_v41 = vld [vmem:[%s141_s4] sm:$0xff]  ;;  %s1579_s25 = scalar_lea.vmem %s1578_s24, 256  ;;  %p1580_p0 = scmp.lt.s32.totalorder %s2222_s14, %s1578_s24 }
  0x20   : > { %1349 = vmatprep.subr.bf16.mxu0 %v1770_v39  ;;  %v413_v51 = vsub.f32 %v1760_v32, %v2286_v44  ;;  %v2283_v53 = vand.u32 4294901760, %v1749_v25  ;;  %v2280_v54 = vand.u32 4294901760, %v1751_v26  ;;  %v1807_v58 = vsub.f32 %v148_v24, %v194_v34  ;;  %p1575_p12 = pnand %p1574_p11, %p1692_p5  ;;  %p1581_p1 = scmp.lt.s32.totalorder %s1579_s25, %s1573_s23 }
  0x21   : > { %v407_v57 = vand.u32 4294901760, %v406_v47  ;;  %v295_v59 = vand.u32 4294901760, %v294_v48  ;;  %v302_v60 = vand.u32 4294901760, %v301_v49  ;;  %v1809_v62 = vpack.c.bf16 %v248_v52, %v245_v50 }
  0x22   : > { %v414_v61 = vand.u32 4294901760, %v413_v51  ;;  %v1811_v63 = vsub.f32 %v165_v37, %v245_v50  ;;  %v420_v0 = vsub.f32 %v1749_v25, %v2283_v53  ;;  %v427_v2 = vsub.f32 %v1751_v26, %v2280_v54  ;;  %p1576_p13 = pneg %p1575_p12  ;;  %p1582_p2 = por %p1581_p1, %p1580_p0 }
  0x23   : > { %1351 = vmatpush3.bf16.msra.mxu0 %v1781_v45  ;;  %v1374_v1 = vpack.c.bf16 %v302_v60, %v295_v59  ;;  %v197_v3 = vand.u32 4294901760, %v149_v55  ;;  %v200_v4 = vand.u32 4294901760, %v150_v56  ;;  %v2279_v9 = vand.u32 4294901760, %v1755_v28 }
  0x24   : > { %v1372_v7 = vpack.c.bf16 %v414_v61, %v407_v57  ;;  %1353 = vmatprep.subr.bf16.mxu0 %v1809_v62  ;;  %v421_v8 = vand.u32 4294901760, %v420_v0  ;;  %v2276_v10 = vand.u32 4294901760, %v1768_v38  ;;  %v1832_v12 = vsub.f32 %v166_v42, %v248_v52  ;;  %v170_v57 = vld [vmem:[%s2266_s1 + $0xd8] sm:$0xff]  ;;  %p1583_p3 = pnand %p1582_p2, %p1576_p13 }
  0x25   : > { %v428_v13 = vand.u32 4294901760, %v427_v2  ;;  %v1834_v16 = vpack.c.bf16 %v200_v4, %v197_v3  ;;  %v1836_v17 = vsub.f32 %v149_v55, %v197_v3  ;;  %v308_v18 = vsub.f32 %v1755_v28, %v2279_v9 }
  0x26   : > { %1373 = vmatprep.subr.bf16.mxu1 %v1372_v7  ;;  %v315_v19 = vsub.f32 %v1768_v38, %v2276_v10  ;;  %v251_v23 = vand.u32 4294901760, %v167_v5  ;;  %v254_v24 = vand.u32 4294901760, %v168_v6  ;;  %v2275_v33 = vand.u32 4294901760, %v1772_v40 }
  0x27   : > { %1375 = vmatpush3.bf16.msra.mxu1 %v1374_v1  ;;  %v1376_v30 = vpack.c.bf16 %v428_v13, %v421_v8  ;;  %1355 = vmatpush3.bf16.msra.mxu0 %v1834_v16  ;;  %v2273_v34 = vand.u32 4294901760, %v1778_v43  ;;  %v203_v37 = vand.u32 4294901760, %v151_v11  ;;  %v1850_v42 = vsub.f32 %v150_v56, %v200_v4  ;;  %v169_v56 = vld [vmem:[%s2266_s1 + $0xd0] sm:$0xff] }
  0x28   : > { %v309_v47 = vand.u32 4294901760, %v308_v18  ;;  %v316_v48 = vand.u32 4294901760, %v315_v19  ;;  %v1852_v49 = vpack.c.bf16 %v254_v24, %v251_v23  ;;  %v1854_v50 = vsub.f32 %v167_v5, %v251_v23  ;;  %v153_v1 = vld [vmem:[%s2266_s1 + $0x50] sm:$0xff]  ;;  %v154_v18 = vld [vmem:[%s2266_s1 + $0x58] sm:$0xff] }
  0x29   : > { %1377 = vmatprep.subr.bf16.mxu1 %v1376_v30  ;;  %v434_v51 = vsub.f32 %v1772_v40, %v2275_v33  ;;  %v441_v52 = vsub.f32 %v1778_v43, %v2273_v34  ;;  %v206_v55 = vand.u32 4294901760, %v152_v29  ;;  %v1869_v60 = vsub.f32 %v168_v6, %v254_v24 }
  0x2a   : > { %v1378_v59 = vpack.c.bf16 %v316_v48, %v309_v47  ;;  %1357 = vmatprep.subr.bf16.mxu0 %v1852_v49  ;;  %v2272_v61 = vand.u32 4294901760, %v1783_v46  ;;  %v2270_v0 = vand.u32 4294901760, %v1807_v58  ;;  %v1878_v5 = vsub.f32 %v151_v11, %v203_v37 }
  0x2b   : > { %v435_v2 = vand.u32 4294901760, %v434_v51  ;;  %v442_v3 = vand.u32 4294901760, %v441_v52  ;;  %v1876_v4 = vpack.c.bf16 %v206_v55, %v203_v37  ;;  %v257_v8 = vand.u32 4294901760, %v169_v56 }
  0x2c   : > { %1379 = vmatpush3.bf16.msra.mxu1 %v1378_v59  ;;  %v322_v6 = vsub.f32 %v1783_v46, %v2272_v61  ;;  %v329_v7 = vsub.f32 %v1807_v58, %v2270_v0  ;;  %v260_v13 = vand.u32 4294901760, %v170_v57  ;;  %v2269_v11 = vand.u32 4294901760, %v1811_v63 }
  0x2d   : > { %v1380_v19 = vpack.c.bf16 %v442_v3, %v435_v2  ;;  %1359 = vmatpush3.bf16.msra.mxu0 %v1876_v4  ;;  %v2268_v23 = vand.u32 4294901760, %v1832_v12  ;;  %v209_v24 = vand.u32 4294901760, %v153_v1  ;;  %v1893_v30 = vsub.f32 %v152_v29, %v206_v55  ;;  %v171_v29 = vld [vmem:[%s2266_s1 + $0xe0] sm:$0xff]  ;;  %v172_v55 = vld [vmem:[%s2266_s1 + $0xe8] sm:$0xff] }
  0x2e   : > { %v323_v37 = vand.u32 4294901760, %v322_v6  ;;  %v330_v47 = vand.u32 4294901760, %v329_v7  ;;  %v1895_v48 = vpack.c.bf16 %v260_v13, %v257_v8  ;;  %v1897_v51 = vsub.f32 %v169_v56, %v257_v8  ;;  %v155_v8 = vld [vmem:[%s2266_s1 + $0x60] sm:$0xff] }
  0x2f   : > { %1381 = vmatprep.subr.bf16.mxu1 %v1380_v19  ;;  %v448_v52 = vsub.f32 %v1811_v63, %v2269_v11  ;;  %v455_v59 = vsub.f32 %v1832_v12, %v2268_v23  ;;  %v212_v2 = vand.u32 4294901760, %v154_v18  ;;  %v1912_v3 = vsub.f32 %v170_v57, %v260_v13 }
  0x30   : > { %v1382_v56 = vpack.c.bf16 %v330_v47, %v323_v37  ;;  %1361 = vmatprep.subr.bf16.mxu0 %v1895_v48  ;;  %v2271_v6 = vand.u32 4294901760, %v1836_v17  ;;  %v2274_v7 = vand.u32 4294901760, %v1850_v42  ;;  %v1921_v0 = vsub.f32 %v153_v1, %v209_v24 }
  0x31   : > { %v449_v19 = vand.u32 4294901760, %v448_v52  ;;  %v456_v23 = vand.u32 4294901760, %v455_v59  ;;  %v1919_v11 = vpack.c.bf16 %v212_v2, %v209_v24  ;;  %v263_v37 = vand.u32 4294901760, %v171_v29  ;;  %v156_v52 = vld [vmem:[%s2266_s1 + $0x68] sm:$0xff] }
  0x32   : > { %1383 = vmatpush3.bf16.msra.mxu1 %v1382_v56  ;;  %v336_v57 = vsub.f32 %v1836_v17, %v2271_v6  ;;  %v343_v13 = vsub.f32 %v1850_v42, %v2274_v7  ;;  %v266_v47 = vand.u32 4294901760, %v172_v55  ;;  %v2278_v24 = vand.u32 4294901760, %v1854_v50 }
  0x33   : > { %v1384_v1 = vpack.c.bf16 %v456_v23, %v449_v19  ;;  %1363 = vmatpush3.bf16.msra.mxu0 %v1919_v11  ;;  %v2277_v59 = vand.u32 4294901760, %v1869_v60  ;;  %v215_v56 = vand.u32 4294901760, %v155_v8  ;;  %v1940_v6 = vsub.f32 %v154_v18, %v212_v2  ;;  %v173_v18 = vld [vmem:[%s2266_s1 + $0xf0] sm:$0xff]  ;;  %v174_v2 = vld [vmem:[%s2266_s1 + $0xf8] sm:$0xff] }
  0x34   : > { %v337_v61 = vand.u32 4294901760, %v336_v57  ;;  %v344_v34 = vand.u32 4294901760, %v343_v13  ;;  %v1942_v7 = vpack.c.bf16 %v266_v47, %v263_v37  ;;  %v1944_v33 = vsub.f32 %v171_v29, %v263_v37 }
  0x35   : > { %1385 = vmatprep.subr.bf16.mxu1 %v1384_v1  ;;  %v462_v23 = vsub.f32 %v1854_v50, %v2278_v24  ;;  %v469_v19 = vsub.f32 %v1869_v60, %v2277_v59  ;;  %v218_v10 = vand.u32 4294901760, %v156_v52  ;;  %v1960_v57 = vsub.f32 %v172_v55, %v266_v47  ;;  %v157_v1 = vld [vmem:[%s2266_s1 + $0x70] sm:$0xff] }
  0x36   : > { %2313 = vst [vmem:[#allocation5_spill] sm:$0xff] %v1942_v7  ;;  %v1386_v29 = vpack.c.bf16 %v344_v34, %v337_v61  ;;  %1365 = vmatprep.subr.bf16.mxu0 %v1942_v7  ;;  %v2281_v13 = vand.u32 4294901760, %v1878_v5  ;;  %v2282_v37 = vand.u32 4294901760, %v1893_v30  ;;  %v1969_v54 = vsub.f32 %v155_v8, %v215_v56 }
  0x37   : > { %v463_v59 = vand.u32 4294901760, %v462_v23  ;;  %v470_v24 = vand.u32 4294901760, %v469_v19  ;;  %v1967_v9 = vpack.c.bf16 %v218_v10, %v215_v56  ;;  %v269_v55 = vand.u32 4294901760, %v173_v18  ;;  %v158_v23 = vld [vmem:[%s2266_s1 + $0x78] sm:$0xff] }
  0x38   : > { %1387 = vmatpush3.bf16.msra.mxu1 %v1386_v29  ;;  %v350_v34 = vsub.f32 %v1878_v5, %v2281_v13  ;;  %v357_v61 = vsub.f32 %v1893_v30, %v2282_v37  ;;  %v272_v47 = vand.u32 4294901760, %v174_v2  ;;  %v2292_v56 = vand.u32 4294901760, %v1897_v51 }
  0x39   : > { %2314 = vst [vmem:[#allocation6_spill] sm:$0xff] %v1967_v9  ;;  %v1388_v8 = vpack.c.bf16 %v470_v24, %v463_v59  ;;  %1367 = vmatpush3.bf16.msra.mxu0 %v1967_v9  ;;  %v2290_v19 = vand.u32 4294901760, %v1912_v3  ;;  %v221_v29 = vand.u32 4294901760, %v157_v1  ;;  %v1986_v13 = vsub.f32 %v156_v52, %v218_v10 }
  0x3a   : > { %v351_v37 = vand.u32 4294901760, %v350_v34  ;;  %v358_v53 = vand.u32 4294901760, %v357_v61  ;;  %v1988_v36 = vpack.c.bf16 %v272_v47, %v269_v55  ;;  %v1990_v35 = vsub.f32 %v173_v18, %v269_v55 }
  0x3b   : > { %1389 = vmatprep.subr.bf16.mxu1 %v1388_v8  ;;  %v476_v24 = vsub.f32 %v1897_v51, %v2292_v56  ;;  %v483_v59 = vsub.f32 %v1912_v3, %v2290_v19  ;;  %v224_v44 = vand.u32 4294901760, %v158_v23  ;;  %v1999_v10 = vsub.f32 %v174_v2, %v272_v47 }
  0x3c   : > { %2315 = vst [vmem:[#allocation7_spill] sm:$0xff] %v1988_v36  ;;  %v1390_v9 = vpack.c.bf16 %v358_v53, %v351_v37  ;;  %1369 = vmatprep.subr.bf16.mxu0 %v1988_v36  ;;  %v2291_v52 = vand.u32 4294901760, %v1921_v0  ;;  %v2293_v18 = vand.u32 4294901760, %v1940_v6  ;;  %v2005_v8 = vsub.f32 %v157_v1, %v221_v29 }
  0x3d   : > { %v477_v34 = vand.u32 4294901760, %v476_v24  ;;  %v484_v61 = vand.u32 4294901760, %v483_v59  ;;  %v2003_v55 = vpack.c.bf16 %v224_v44, %v221_v29  ;;  %v176_v2 = vcombine.high %v142_v41, %v142_v41 }
  0x3e   : > { %1391 = vmatpush3.bf16.msra.mxu1 %v1390_v9  ;;  %v364_v19 = vsub.f32 %v1921_v0, %v2291_v52  ;;  %v371_v53 = vsub.f32 %v1940_v6, %v2293_v18  ;;  %v2013_v37 = vand.u32 4294901760, %v142_v41  ;;  %v2296_v24 = vand.u32 4294901760, %v1944_v33 }
  0x3f   : > { %2316 = vst [vmem:[#allocation8_spill] sm:$0xff] %v2003_v55  ;;  %v1392_v47 = vpack.c.bf16 %v484_v61, %v477_v34  ;;  %1371 = vmatpush3.bf16.msra.mxu0 %v2003_v55  ;;  %v2299_v1 = vand.u32 4294901760, %v1960_v57  ;;  %v1404_v9 = vpack.c.bf16 %v1760_v32, %v1758_v31  ;;  %v2020_v52 = vand.u32 4294901760, %v176_v2 }
  0x40   : > { %v365_v29 = vand.u32 4294901760, %v364_v19  ;;  %v372_v59 = vand.u32 4294901760, %v371_v53  ;;  %v2023_v56 = vsub.f32 %v142_v41, %v2013_v37  ;;  %v490_v34 = vsub.f32 %v1944_v33, %v2296_v24 }
  0x41   : > { %2317 = vst [vmem:[#allocation9_spill] sm:$0xff] %v2020_v52  ;;  %1393 = vmatprep.subr.bf16.mxu1 %v1392_v47  ;;  %v497_v61 = vsub.f32 %v1960_v57, %v2299_v1  ;;  %1405 = vmatprep.subr.bf16.mxu0 %v1404_v9  ;;  %v2300_v18 = vand.u32 4294901760, %v1969_v54  ;;  %v2301_v19 = vand.u32 4294901760, %v1986_v13  ;;  %v2033_v53 = vsub.f32 %v158_v23, %v224_v44 }
  0x42   : > { %2318 = vst [vmem:[#allocation10_spill] sm:$0xff] %v2023_v56  ;;  %v1394_v55 = vpack.c.bf16 %v372_v59, %v365_v29  ;;  %v2036_v41 = vsub.f32 %v176_v2, %v2020_v52  ;;  %v2304_v47 = vand.u32 4294901760, %v2023_v56  ;;  %515 = vmatprep.mubr.f32.mxu1 %v2020_v52  ;;  %v491_v24 = vand.u32 4294901760, %v490_v34 }
  0x43   : > { %v498_v36 = vand.u32 4294901760, %v497_v61  ;;  %v378_v9 = vsub.f32 %v1969_v54, %v2300_v18  ;;  %v385_v1 = vsub.f32 %v1986_v13, %v2301_v19  ;;  %v2309_v2 = vand.u32 4294901760, %v1990_v35 }
  0x44   : > { %1395 = vmatpush3.bf16.msra.mxu1 %v1394_v55  ;;  %v276_v44 = vand.u32 4294901760, %v2036_v41  ;;  %v283_v23 = vsub.f32 %v2023_v56, %v2304_v47  ;;  %v510_v29 = vand.u32 4294901760, %v1999_v10  ;;  %v2310_v56 = vand.u32 4294901760, %v2005_v8 }
  0x45   : > { %v1396_v59 = vpack.c.bf16 %v498_v36, %v491_v24  ;;  %v379_v34 = vand.u32 4294901760, %v378_v9  ;;  %v386_v61 = vand.u32 4294901760, %v385_v1  ;;  %v504_v19 = vsub.f32 %v1990_v35, %v2309_v2 }
  0x46   : > { %v277_v18 = vsub.f32 %v2036_v41, %v276_v44  ;;  %v511_v55 = vsub.f32 %v1999_v10, %v510_v29  ;;  %v284_v52 = vand.u32 4294901760, %v283_v23  ;;  %v398_v7 = vand.u32 4294901760, %v2033_v53 }
  0x47   : > { %1397 = vmatprep.subr.bf16.mxu1 %v1396_v59  ;;  %v1398_v47 = vpack.c.bf16 %v386_v61, %v379_v34  ;;  %v1406_v24 = vpack.c.bf16 %v1738_v21, %v1728_v15  ;;  %v505_v1 = vand.u32 4294901760, %v504_v19  ;;  %v1408_v2 = vpack.c.bf16 %v1751_v26, %v1749_v25 }
  0x48   : > { %v278_v36 = vand.u32 4294901760, %v277_v18  ;;  %v512_v9 = vand.u32 4294901760, %v511_v55  ;;  %v392_v59 = vsub.f32 %v2005_v8, %v2310_v56  ;;  %v399_v23 = vsub.f32 %v2033_v53, %v398_v7 }
  0x49   : > { %1399 = vmatpush3.bf16.msra.mxu1 %v1398_v47  ;;  %v1410_v19 = vpack.c.bf16 %v1768_v38, %v1755_v28  ;;  %v1412_v47 = vpack.c.bf16 %v1778_v43, %v1772_v40  ;;  %v1414_v56 = vpack.c.bf16 %v1807_v58, %v1783_v46  ;;  %vm1043_vm1 = vcmask 519168  }
  0x4a   : > { %279 = vmatprep.mubr.f32.mxu0 %v278_v36  ;;  %v1400_v34 = vpack.c.bf16 %v512_v9, %v505_v1  ;;  %v393_v18 = vand.u32 4294901760, %v392_v59  ;;  %v400_v61 = vand.u32 4294901760, %v399_v23  ;;  %v2319_v36 = vand.u32 4294901760, %v1758_v31 }
  0x4b   : > { %285 = vmatmul.mubr.f32.vlgmr.msra.gmra.mrb[0].mxu0 %v284_v52  ;;  %v2320_v52 = vand.u32 4294901760, %v1760_v32  ;;  %v2322_v9 = vand.u32 4294901760, %v1738_v21  ;;  %v2323_v23 = vand.u32 4294901760, %v1749_v25  ;;  %v2327_v31 = vand.u32 4294901760, %v1772_v40 }
  0x4c   : > { %1407 = vmatpush3.bf16.msra.mxu0 %v1406_v24  ;;  %1401 = vmatprep.subr.bf16.mxu1 %v1400_v34  ;;  %v1402_v55 = vpack.c.bf16 %v400_v61, %v393_v18  ;;  %v2321_v24 = vand.u32 4294901760, %v1728_v15  ;;  %v2325_v18 = vand.u32 4294901760, %v1755_v28  ;;  %v2326_v61 = vand.u32 4294901760, %v1768_v38 }
  0x4d   : > { %1409 = vmatprep.subr.bf16.mxu0 %v1408_v2  ;;  %652 = vmatprep.mubr.f32.mxu0 %v2036_v41  ;;  %v1468_v1 = vpack.c.bf16 %v2320_v52, %v2319_v36  ;;  %v2324_v2 = vand.u32 4294901760, %v1751_v26  ;;  %v2328_v32 = vand.u32 4294901760, %v1778_v43  ;;  %v2329_v15 = vand.u32 4294901760, %v1783_v46 }
  0x4e   : > { %v1470_v59 = vpack.c.bf16 %v2322_v9, %v2321_v24  ;;  %v1474_v41 = vpack.c.bf16 %v2326_v61, %v2325_v18  ;;  %1403 = vmatpush3.bf16.msra.mxu1 %v1402_v55  ;;  %v2330_v21 = vand.u32 4294901760, %v1807_v58  ;;  %v2331_v25 = vand.u32 4294901760, %v1811_v63 }
  0x4f   : > { %v1472_v34 = vpack.c.bf16 %v2324_v2, %v2323_v23  ;;  %v1476_v36 = vpack.c.bf16 %v2328_v32, %v2327_v31  ;;  %v2332_v26 = vand.u32 4294901760, %v1832_v12  ;;  %v2333_v28 = vand.u32 4294901760, %v1836_v17  ;;  %1437 = vmatprep.subr.bf16.mxu1 %v1726_v14 }
  0x50   : > { %v1478_v52 = vpack.c.bf16 %v2330_v21, %v2329_v15  ;;  %v2334_v38 = vand.u32 4294901760, %v1850_v42  ;;  %v2335_v40 = vand.u32 4294901760, %v1854_v50  ;;  %v2336_v43 = vand.u32 4294901760, %v1869_v60  ;;  %1411 = vmatpush3.bf16.msra.mxu0 %v1410_v19 }
  0x51   : > { %v1480_v24 = vpack.c.bf16 %v2332_v26, %v2331_v25  ;;  %v2337_v46 = vand.u32 4294901760, %v1878_v5  ;;  %v2338_v58 = vand.u32 4294901760, %v1893_v30  ;;  %v2339_v2 = vand.u32 4294901760, %v1897_v51  ;;  %1413 = vmatprep.subr.bf16.mxu0 %v1412_v47  ;;  %517 = vmatmul.mubr.f32.vlgmr.msra.gmra.mrb[0].mxu1 %v2013_v37 }
  0x52   : > { %v1482_v9 = vpack.c.bf16 %v2334_v38, %v2333_v28  ;;  %v1484_v55 = vpack.c.bf16 %v2336_v43, %v2335_v40  ;;  %v2340_v18 = vand.u32 4294901760, %v1912_v3  ;;  %v2341_v31 = vand.u32 4294901760, %v1921_v0  ;;  %1439 = vmatpush3.bf16.msra.mxu1 %v1736_v20  ;;  %759 = vmatprep.mubr.f32.mxu1 %v276_v44 }
  0x53   : > { %v1486_v23 = vpack.c.bf16 %v2338_v58, %v2337_v46  ;;  %v2342_v32 = vand.u32 4294901760, %v1940_v6  ;;  %v1416_v19 = vpack.c.bf16 %v1832_v12, %v1811_v63  ;;  %v2343_v21 = vand.u32 4294901760, %v1969_v54  ;;  %1441 = vmatprep.subr.bf16.mxu1 %v1740_v22 }
  0x54   : > { %v1488_v61 = vpack.c.bf16 %v2340_v18, %v2339_v2  ;;  %v2344_v25 = vand.u32 4294901760, %v1986_v13  ;;  %1415 = vmatpush3.bf16.msra.mxu0 %v1414_v56  ;;  %v1418_v47 = vpack.c.bf16 %v1850_v42, %v1836_v17  ;;  %v1420_v63 = vpack.c.bf16 %v1869_v60, %v1854_v50 }
  0x55   : > { %v2127_v15 = vpack.c.bf16 %v2342_v32, %v2341_v31  ;;  %1417 = vmatprep.subr.bf16.mxu0 %v1416_v19  ;;  %v1422_v12 = vpack.c.bf16 %v1893_v30, %v1878_v5  ;;  %v1424_v56 = vpack.c.bf16 %v1912_v3, %v1897_v51  ;;  %v1426_v17 = vpack.c.bf16 %v1940_v6, %v1921_v0  ;;  %v2345_v5 = vld [vmem:[#allocation5_spill] sm:$0xff]  ;;  %v2347_v30 = vld [vmem:[#allocation6_spill] sm:$0xff]  ;;  %v2348_v51 = vld [vmem:[#allocation7_spill] sm:$0xff] }
  0x56   : > { %v2135_v26 = vpack.c.bf16 %v2344_v25, %v2343_v21  ;;  %1443 = vmatpush3.bf16.msra.mxu1 %v1753_v27  ;;  %v1428_v42 = vpack.c.bf16 %v1960_v57, %v1944_v33  ;;  %v1430_v50 = vpack.c.bf16 %v1986_v13, %v1969_v54  ;;  %v1432_v60 = vpack.c.bf16 %v1999_v10, %v1990_v35  ;;  %v2346_v54 = vld [vmem:[#allocation10_spill] sm:$0xff]  ;;  %v2349_v3 = vld [vmem:[#allocation9_spill] sm:$0xff]  ;;  %v2350_v6 = vld [vmem:[#allocation8_spill] sm:$0xff] }
  0x57   : > { %1445 = vmatprep.subr.bf16.mxu1 %v1770_v39  ;;  %v1434_v0 = vpack.c.bf16 %v2033_v53, %v2005_v8  ;;  %v2351_v13 = vand.u32 4294901760, %v2346_v54 }
  0x58   : > { %1419 = vmatpush3.bf16.msra.mxu0 %v1418_v47 }
  0x59   : > { %1421 = vmatprep.subr.bf16.mxu0 %v1420_v63 }
  0x5a   : > { %1447 = vmatpush3.bf16.msra.mxu1 %v1781_v45 }
  0x5b   : > { %1449 = vmatprep.subr.bf16.mxu1 %v1809_v62 }
  0x5c   : > { %1423 = vmatpush3.bf16.msra.mxu0 %v1422_v12 }
  0x5d   : > { %1425 = vmatprep.subr.bf16.mxu0 %v1424_v56 }
  0x5e   : > { %1451 = vmatpush3.bf16.msra.mxu1 %v1834_v16 }
  0x5f   : > { %1453 = vmatprep.subr.bf16.mxu1 %v1852_v49 }
  0x60   : > { %1427 = vmatpush3.bf16.msra.mxu0 %v1426_v17 }
  0x61   : > { %1429 = vmatprep.subr.bf16.mxu0 %v1428_v42 }
  0x62   : > { %1455 = vmatpush3.bf16.msra.mxu1 %v1876_v4 }
  0x63   : > { %1457 = vmatprep.subr.bf16.mxu1 %v1895_v48 }
  0x64   : > { %1431 = vmatpush3.bf16.msra.mxu0 %v1430_v50 }
  0x65   : > { %1433 = vmatprep.subr.bf16.mxu0 %v1432_v60 }
  0x66   : > { %1459 = vmatpush3.bf16.msra.mxu1 %v1919_v11 }
  0x67   : > { %1461 = vmatprep.subr.bf16.mxu1 %v2345_v5 }
  0x68   : > { %1435 = vmatpush3.bf16.msra.mxu0 %v1434_v0 }
  0x69   : > { %1469 = vmatprep.subr.bf16.mxu0 %v1468_v1 }
  0x6a   : > { %1463 = vmatpush3.bf16.msra.mxu1 %v2347_v30 }
  0x6b   : > { %655 = vmatmul.mubr.f32.vlgmr.msra.gmra.mrb[2].mxu0 %v2346_v54  ;;  %1465 = vmatprep.subr.bf16.mxu1 %v2348_v51 }
  0x6c   : > { %1471 = vmatpush3.bf16.msra.mxu0 %v1470_v59  ;;  %929 = vmatprep.mubr.f32.mxu0 %v2349_v3 }
  0x6d   : > { %1473 = vmatprep.subr.bf16.mxu0 %v1472_v34 }
  0x6e   : > { %1467 = vmatpush3.bf16.msra.mxu1 %v2350_v6 }
  0x6f   : > { %1501 = vmatprep.subr.bf16.mxu1 %v1726_v14  ;;  %v2352_v14 = vand.u32 4294901760, %v1944_v33 }
  0x70   : > { %1475 = vmatpush3.bf16.msra.mxu0 %v1474_v41 }
  0x71   : > { %1477 = vmatprep.subr.bf16.mxu0 %v1476_v36  ;;  %763 = vmatmul.mubr.f32.vlgmr.msra.gmra.mrb[2].mxu1 %v2351_v13 }
  0x72   : > { %1503 = vmatpush3.bf16.msra.mxu1 %v1736_v20  ;;  %1033 = vmatprep.mubr.f32.mxu1 %v2349_v3  ;;  %v2353_v20 = vand.u32 4294901760, %v1960_v57 }
  0x73   : > { %1505 = vmatprep.subr.bf16.mxu1 %v1740_v22  ;;  %v2354_v22 = vand.u32 4294901760, %v1990_v35  ;;  %v1637_v35 = vmov 0.0  }
  0x74   : > { %1479 = vmatpush3.bf16.msra.mxu0 %v1478_v52  ;;  %v1492_v44 = vpack.c.bf16 %v2353_v20, %v2352_v14  ;;  %1041 = vst.msk [vmem:[%s2211_s7] sm:$0x3] %vm1040_vm0, %v1637_v35  ;;  %1042 = vst.msk [vmem:[%s2211_s7 + $0x6] sm:$0x3] %vm1040_vm0, %v1637_v35 }
  0x75   : > { %1481 = vmatprep.subr.bf16.mxu0 %v1480_v24 }
  0x76   : > { %1507 = vmatpush3.bf16.msra.mxu1 %v1753_v27  ;;  %v1496_v27 = vpack.c.bf16 %v510_v29, %v2354_v22 }
  0x77   : > { %1509 = vmatprep.subr.bf16.mxu1 %v1770_v39  ;;  %v2355_v39 = vand.u32 4294901760, %v2005_v8 }
  0x78   : > { %1483 = vmatpush3.bf16.msra.mxu0 %v1482_v9 }
  0x79   : > { %1485 = vmatprep.subr.bf16.mxu0 %v1484_v55 }
  0x7a   : > { %1511 = vmatpush3.bf16.msra.mxu1 %v1781_v45  ;;  %v1498_v45 = vpack.c.bf16 %v398_v7, %v2355_v39 }
  0x7b   : > { %1513 = vmatprep.subr.bf16.mxu1 %v1809_v62 }
  0x7c   : > { %1487 = vmatpush3.bf16.msra.mxu0 %v1486_v23 }
  0x7d   : > { %1489 = vmatprep.subr.bf16.mxu0 %v1488_v61 }
  0x7e   : > { %1515 = vmatpush3.bf16.msra.mxu1 %v1834_v16 }
  0x7f   : > { %1517 = vmatprep.subr.bf16.mxu1 %v1852_v49 }
  0x80   : > { %1491 = vmatpush3.bf16.msra.mxu0 %v2127_v15 }
  0x81   : > { %1493 = vmatprep.subr.bf16.mxu0 %v1492_v44 }
  0x82   : > { %1519 = vmatpush3.bf16.msra.mxu1 %v1876_v4 }
  0x83   : > { %1521 = vmatprep.subr.bf16.mxu1 %v1895_v48 }
  0x84   : > { %1495 = vmatpush3.bf16.msra.mxu0 %v2135_v26 }
  0x85   : > { %1497 = vmatprep.subr.bf16.mxu0 %v1496_v27 }
  0x86   : > { %1523 = vmatpush3.bf16.msra.mxu1 %v1919_v11 }
  0x87   : > { %1525 = vmatprep.subr.bf16.mxu1 %v2345_v5 }
  0x88   : > { %1499 = vmatpush3.bf16.msra.mxu0 %v1498_v45 }
  0x8a   : > { %1527 = vmatpush3.bf16.msra.mxu1 %v2347_v30 }
  0x8b   : > { %931 = vmatmul.mubr.f32.vlgmr.msra.gmra.mrb[4].mxu0 %v2013_v37  ;;  %1529 = vmatprep.subr.bf16.mxu1 %v2348_v51 }
  0x8e   : > { %1531 = vmatpush3.bf16.msra.mxu1 %v2350_v6 }
  0x91   : > { %1035 = vmatmul.mubr.f32.vlgmr.msra.gmra.mrb[4].mxu1 %v2013_v37 }
 0x11e   : > { %v1162_v62 = vpop.f32.mrb[0].mxu0 }
 0x11f   : > { %v1163_v16 = vpop.f32.mrb[1].mxu0 }
 0x120   : > { %v1164_v33 = vadd.f32 %v1163_v16, %v1162_v62 }
 0x124   : > { %v1197_v49 = vpop.f32.mrb[0].mxu1 }
 0x125   : > { %v1198_v4 = vpop.f32.mrb[1].mxu1 }
 0x126   : > { %v1199_v11 = vadd.f32 %v1198_v4, %v1197_v49 }
 0x128   : > { %v519_v48 = vadd.f32 %v1199_v11, %v1164_v33 }
 0x13e   : > { %v1232_v7 = vpop.f32.mrb[2].mxu0 }
 0x13f   : > { %v1233_v57 = vpop.f32.mrb[3].mxu0 }
 0x140   : > { %v1234_v10 = vadd.f32 %v1233_v57, %v1232_v7 }
 0x142   : > { %v657_v8 = vadd.f32 %v1234_v10, %v519_v48 }
 0x144   : > { %v1267_v37 = vpop.f32.mrb[2].mxu1 }
 0x145   : > { %v1268_v53 = vpop.f32.mrb[3].mxu1 }
 0x146   : > { %v1269_v29 = vadd.f32 %v1268_v53, %v1267_v37 }
 0x148   : > { %v765_v1 = vadd.f32 %v1269_v29, %v657_v8 }
 0x15e   : > { %v1302_v59 = vpop.f32.mrb[4].mxu0 }
 0x15f   : > { %v1303_v34 = vpop.f32.mrb[5].mxu0 }
 0x160   : > { %v1304_v41 = vadd.f32 %v1303_v34, %v1302_v59 }
 0x162   : > { %v933_v36 = vadd.f32 %v1304_v41, %v765_v1 }
 0x164   : > { %v1337_v52 = vpop.f32.mrb[4].mxu1 }
 0x165   : > { %v1338_v24 = vpop.f32.mrb[5].mxu1 }
 0x166   : > { %v1339_v28 = vadd.f32 %v1338_v24, %v1337_v52 }
 0x168   : > { %v1037_v38 = vadd.f32 %v1339_v28, %v933_v36 }
 0x16a   : > { %1044 = vst.msk [vmem:[%s2211_s7 + $0x2] sm:$0xf] %vm1043_vm1, %v1037_v38 }
 0x16b   : > { %1586 = shalt.err (!%p1583_p3)
}
 0x16c   : > { %s1587_s26 = scalar_lea.hbm %s2220_s21, 128  ;;  %s1591_s29 = scalar_lea.hbm %s2267_s2, 256 }
 0x16d   : > { %p1588_p4 = scmp.ne.s32.totalorder %s2220_s21, %s1587_s26  ;;  %p1592_p9 = scmp.lt.u32.totalorder %s2220_s21, %s2267_s2 }
 0x16e   : > { %p1593_p10 = scmp.lt.u32.totalorder %s1591_s29, %s1587_s26  ;;  %p1595_p12 = scmp.lt.u32.totalorder %s1587_s26, %s2220_s21 }
 0x16f   : > { %p1589_p7 = pnand %p1588_p4, %p1692_p5 }
 0x170   : > { %p1594_p11 = por %p1593_p10, %p1592_p9 }
 0x171   : > { %p1590_p8 = pneg %p1589_p7 }
 0x172   : > { %p1596_p13 = por %p1595_p12, %p1594_p11 }
 0x174   : > { %p1597_p0 = pnand %p1596_p13, %p1590_p8 }
 0x176   : > { %1600 = shalt.err (!%p1597_p0)
}
 0x177   : > { %1532 = dma.vmem_to_hbm [thread:$0]  (%p1692_p5), %s2222_s14, 128, %s2220_s21, %s1046_s22  }
 0x178 PF: > { %p1538_p1 = scmp.ge.s32.totalorder %s1635_s12, 2  ;;  %s1071_s4 = sand.u32 1, %s1623_s9  }
 0x179   : > { %s1072_s5 = scalar_lea.sflag [#allocation3], %s1071_s4 }
 0x17a   : > { %p1535_p2 = pnand %p1538_p1, %p1696_p6 }
 0x17c   : > { %1618 = dma.done.wait (!%p1535_p2), %s1072_s5, 128  }
 0x17d   : > { %1620 = vsyncadd (!%p1535_p2), %s1072_s5, 4294967168  ;;  %p12_p3 = scmp.ge.s32.totalorder %s1679_s15, 4   ;;  %s2356_s9 = smov %s1627_s10 }
 0x17e   : > { %s2357_s10 = smov %s1631_s11  ;;  %s2358_s11 = smov %s1690_s18 }
 0x17f   : > { %s2359_s12 = smov %s1679_s15  ;;  %14 = sbr.rel (!%p12_p3) target bundleno = 3 (0x3), region = 63 }
 0x186   :  { %1077 = vsyncpa [#allocation3], 1 }
 0x187   :  { %1079 = vsyncpa [#allocation3 + $0x1], 1 }

</bundles_post_ra>
